<compile_context>
chip_gen: v7x
topology: tpu7x:2x2x1
jax: 0.10.0
libtpu: 0.0.40
codegen_flags: <defaults>
</compile_context>

<pallas_src>
import functools
import math

import jax
import jax.numpy as jnp
from jax.experimental import pallas as pl
from jax.experimental.pallas import tpu as pltpu


def _round_up(x, m):
    return ((x + m - 1) // m) * m


def lora_linear_kernel(x_ref, wt_ref, bias_ref, at_ref, bt_ref, o_ref,
                       acc_ref, xa_ref):
    """One (tm, tn) output tile, accumulated over the K grid axis.

    x_ref   : (tm, tk)      input tile
    wt_ref  : (tk, tn)      W^T tile (pre-transposed in wrapper)
    bias_ref: (1, tn)       bias tile
    at_ref  : (tk, r_pad)   A^T tile (pre-transposed in wrapper)
    bt_ref  : (r_pad, tn)   (scaling * B)^T tile (pre-scaled in wrapper)
    acc_ref : (tm, tn) f32  base-matmul accumulator (VMEM scratch)
    xa_ref  : (tm, r_pad)   x @ A^T accumulator (VMEM scratch)
    """
    k = pl.program_id(2)

    @pl.when(k == 0)
    def _():
        acc_ref[...] = jnp.zeros_like(acc_ref)
        xa_ref[...] = jnp.zeros_like(xa_ref)

    x = x_ref[...]
    # Base linear partial product: x_tile @ W^T_tile  (MXU, f32 accumulate)
    acc_ref[...] += jnp.dot(x, wt_ref[...], preferred_element_type=jnp.float32)
    # LoRA down-projection partial product: x_tile @ A^T_tile
    xa_ref[...] += jnp.dot(x, at_ref[...], preferred_element_type=jnp.float32)

    @pl.when(k == pl.num_programs(2) - 1)
    def _():
        # LoRA up-projection; scaling already folded into bt.
        upd = jnp.dot(xa_ref[...].astype(bt_ref.dtype), bt_ref[...],
                      preferred_element_type=jnp.float32)
        o_ref[...] = (acc_ref[...] + bias_ref[...] + upd).astype(o_ref.dtype)


def lora_linear(x, w, bias, lora_A, lora_B, *, lora_alpha=4,
                tm=256, tn=256, tk=512):
    """result = x @ W^T + bias + ((x @ A^T) @ B^T) * (lora_alpha / r)."""
    M, in_f = x.shape
    out_f = w.shape[0]
    r = 0 if lora_A is None else lora_A.shape[0]
    scaling = lora_alpha / r if r > 0 else 0.0

    # Wrapper-side layout plumbing: transpose once, fold scaling into B.
    w_t = w.T                                        # (in, out)
    if r > 0:
        a_t = lora_A.T                               # (in, r)
        b_t = (lora_B * scaling).T                   # (r, out)
    else:
        # r == 0: LoRA path contributes nothing; use a zero rank-1 placeholder
        # so BlockSpecs never see a zero-sized dimension.
        r = 1
        a_t = jnp.zeros((in_f, 1), dtype=x.dtype)
        b_t = jnp.zeros((1, out_f), dtype=x.dtype)
    if bias is None:
        bias = jnp.zeros((out_f,), dtype=x.dtype)

    # Clip tile sizes for small problems while keeping TPU alignment:
    # lane (last) dims multiples of 128, sublane dims multiples of 8.
    tm = min(tm, _round_up(M, 8))
    tn = min(tn, _round_up(out_f, 128))
    tk = min(tk, _round_up(in_f, 128))
    r_pad = max(_round_up(r, 8), 8)

    Mp = _round_up(M, tm)
    Np = _round_up(out_f, tn)
    Kp = _round_up(in_f, tk)

    # Zero-pad everything to tile-aligned shapes (zeros contribute nothing to
    # any of the contractions; padded rows/cols are sliced off at the end).
    x_p = jnp.pad(x, ((0, Mp - M), (0, Kp - in_f)))
    wt_p = jnp.pad(w_t, ((0, Kp - in_f), (0, Np - out_f)))
    bias_p = jnp.pad(bias.reshape(1, out_f), ((0, 0), (0, Np - out_f)))
    at_p = jnp.pad(a_t, ((0, Kp - in_f), (0, r_pad - r)))
    bt_p = jnp.pad(b_t, ((0, r_pad - r), (0, Np - out_f)))

    grid = (Mp // tm, Np // tn, Kp // tk)

    out_p = pl.pallas_call(
        lora_linear_kernel,
        out_shape=jax.ShapeDtypeStruct((Mp, Np), x.dtype),
        grid_spec=pltpu.PrefetchScalarGridSpec(
            num_scalar_prefetch=0,
            grid=grid,
            in_specs=[
                pl.BlockSpec((tm, tk), lambda i, j, k: (i, k)),      # x tile
                pl.BlockSpec((tk, tn), lambda i, j, k: (k, j)),      # W^T tile
                pl.BlockSpec((1, tn), lambda i, j, k: (0, j)),       # bias tile
                pl.BlockSpec((tk, r_pad), lambda i, j, k: (k, 0)),   # A^T tile
                pl.BlockSpec((r_pad, tn), lambda i, j, k: (0, j)),   # (s*B)^T tile
            ],
            out_specs=pl.BlockSpec((tm, tn), lambda i, j, k: (i, j)),
            scratch_shapes=[
                pltpu.VMEM((tm, tn), jnp.float32),    # base accumulator
                pltpu.VMEM((tm, r_pad), jnp.float32), # x @ A^T accumulator
            ],
        ),
        compiler_params=pltpu.CompilerParams(
            dimension_semantics=("parallel", "parallel", "arbitrary")),
    )(x_p, wt_p, bias_p, at_p, bt_p)

    return out_p[:M, :out_f]


if __name__ == "__main__":
    # Small shapes consistent with nn.Linear: batch=8, in=32, out=64, r=4.
    batch, in_f, out_f, r, lora_alpha = 8, 32, 64, 4, 4

    key = jax.random.PRNGKey(0)
    k_x, k_w, k_b, k_a, k_bb = jax.random.split(key, 5)

    x = jax.random.normal(k_x, (batch, in_f), dtype=jnp.float32)

    # Frozen base Linear weights (kaiming-uniform-like ranges).
    bound_w = 1.0 / math.sqrt(in_f)
    w = jax.random.uniform(k_w, (out_f, in_f), minval=-bound_w, maxval=bound_w,
                           dtype=jnp.float32)
    bias = jax.random.uniform(k_b, (out_f,), minval=-bound_w, maxval=bound_w,
                              dtype=jnp.float32)

    # LoRA params. PyTorch init uses kaiming_uniform_ for A and zeros for B;
    # B is given small nonzero values here so the LoRA path is exercised.
    bound_a = math.sqrt(6.0 / in_f)
    lora_A = jax.random.uniform(k_a, (r, in_f), minval=-bound_a, maxval=bound_a,
                                dtype=jnp.float32)
    lora_B = 0.01 * jax.random.normal(k_bb, (out_f, r), dtype=jnp.float32)
    # TODO(synk): lora_dropout=0.0 -> Identity, so dropout is omitted.

    out = lora_linear(x, w, bias, lora_A, lora_B, lora_alpha=lora_alpha)
    out = jax.block_until_ready(out)

    # Pure-JAX reference check.
    scaling = lora_alpha / r
    ref = x @ w.T + bias + (x @ lora_A.T) @ lora_B.T * scaling
    assert out.shape == ref.shape, "shape mismatch vs reference"
    assert jnp.allclose(out, ref, atol=1e-4, rtol=1e-4), "mismatch vs reference"

    print("KERNEL_OK")
</pallas_src>

<mosaic_0001>
module attributes {stable_mosaic.version = 11 : i64} {
  func.func @lora_linear_kernel(%arg0: i32, %arg1: i32, %arg2: i32, %arg3: memref<8x128xf32, #tpu.memory_space<vmem>>, %arg4: memref<128x128xf32, #tpu.memory_space<vmem>>, %arg5: memref<1x128xf32, #tpu.memory_space<vmem>>, %arg6: memref<128x8xf32, #tpu.memory_space<vmem>>, %arg7: memref<8x128xf32, #tpu.memory_space<vmem>>, %arg8: memref<8x128xf32, #tpu.memory_space<vmem>>, %arg9: memref<8x128xf32, #tpu.memory_space<vmem>>, %arg10: memref<8x8xf32, #tpu.memory_space<vmem>>) attributes {dimension_semantics = [#tpu.dimension_semantics<parallel>, #tpu.dimension_semantics<parallel>, #tpu.dimension_semantics<arbitrary>], iteration_bounds = array<i64: 1, 1, 1>, scalar_prefetch = 0 : i64, scratch_operands = 2 : i64, tpu.core_type = #tpu.core_type<tc>, window_params = [{transform_indices = @transform_0, window_bounds = array<i64: 8, 128>}, {transform_indices = @transform_1, window_bounds = array<i64: 128, 128>}, {transform_indices = @transform_2, window_bounds = array<i64: 1, 128>}, {transform_indices = @transform_3, window_bounds = array<i64: 128, 8>}, {transform_indices = @transform_4, window_bounds = array<i64: 8, 128>}, {transform_indices = @transform_5, window_bounds = array<i64: 8, 128>}]} {
    %c0_i32 = arith.constant 0 : i32
    %0 = arith.cmpi eq, %arg2, %c0_i32 : i32
    %1 = arith.extui %0 : i1 to i32
    %c0_i32_0 = arith.constant 0 : i32
    %2 = arith.cmpi ne, %1, %c0_i32_0 : i32
    scf.if %2 {
      %cst_17 = arith.constant 0.000000e+00 : f32
      %17 = vector.broadcast %cst_17 : f32 to vector<8x128xf32>
      %c0_18 = arith.constant 0 : index
      %c0_19 = arith.constant 0 : index
      %18 = vector.load %arg9[%c0_18, %c0_19] : memref<8x128xf32, #tpu.memory_space<vmem>>, vector<8x128xf32>
      tpu.vector_store %arg9[%c0_18, %c0_19], %17 {strides = array<i32>} : memref<8x128xf32, #tpu.memory_space<vmem>>, vector<8x128xf32>,
      %cst_20 = arith.constant 0.000000e+00 : f32
      %19 = vector.broadcast %cst_20 : f32 to vector<8x8xf32>
      %c0_21 = arith.constant 0 : index
      %c0_22 = arith.constant 0 : index
      %20 = vector.load %arg10[%c0_21, %c0_22] : memref<8x8xf32, #tpu.memory_space<vmem>>, vector<8x8xf32>
      tpu.vector_store %arg10[%c0_21, %c0_22], %19 {strides = array<i32>} : memref<8x8xf32, #tpu.memory_space<vmem>>, vector<8x8xf32>,
    } else {
    }
    %c0 = arith.constant 0 : index
    %c0_1 = arith.constant 0 : index
    %3 = vector.load %arg3[%c0, %c0_1] : memref<8x128xf32, #tpu.memory_space<vmem>>, vector<8x128xf32>
    %c0_2 = arith.constant 0 : index
    %c0_3 = arith.constant 0 : index
    %4 = vector.load %arg9[%c0_2, %c0_3] : memref<8x128xf32, #tpu.memory_space<vmem>>, vector<8x128xf32>
    %c0_4 = arith.constant 0 : index
    %c0_5 = arith.constant 0 : index
    %5 = vector.load %arg4[%c0_4, %c0_5] : memref<128x128xf32, #tpu.memory_space<vmem>>, vector<128x128xf32>
    %cst = arith.constant dense<0.000000e+00> : vector<8x128xf32>
    %6 = tpu.matmul %3, %5, %cst {dimension_numbers = #tpu.dot_dimension_numbers<[1], [0], [0], [1], [0, 0, 1, 1], [], []>} : vector<8x128xf32>, vector<128x128xf32>, vector<8x128xf32> -> vector<8x128xf32>
    %7 = arith.addf %4, %6 : vector<8x128xf32>
    %c0_6 = arith.constant 0 : index
    %c0_7 = arith.constant 0 : index
    %8 = vector.load %arg9[%c0_6, %c0_7] : memref<8x128xf32, #tpu.memory_space<vmem>>, vector<8x128xf32>
    tpu.vector_store %arg9[%c0_6, %c0_7], %7 {strides = array<i32>} : memref<8x128xf32, #tpu.memory_space<vmem>>, vector<8x128xf32>,
    %c0_8 = arith.constant 0 : index
    %c0_9 = arith.constant 0 : index
    %9 = vector.load %arg10[%c0_8, %c0_9] : memref<8x8xf32, #tpu.memory_space<vmem>>, vector<8x8xf32>
    %c0_10 = arith.constant 0 : index
    %c0_11 = arith.constant 0 : index
    %10 = vector.load %arg6[%c0_10, %c0_11] : memref<128x8xf32, #tpu.memory_space<vmem>>, vector<128x8xf32>
    %cst_12 = arith.constant dense<0.000000e+00> : vector<8x8xf32>
    %11 = tpu.matmul %3, %10, %cst_12 {dimension_numbers = #tpu.dot_dimension_numbers<[1], [0], [0], [1], [0, 0, 1, 1], [], []>} : vector<8x128xf32>, vector<128x8xf32>, vector<8x8xf32> -> vector<8x8xf32>
    %12 = arith.addf %9, %11 : vector<8x8xf32>
    %c0_13 = arith.constant 0 : index
    %c0_14 = arith.constant 0 : index
    %13 = vector.load %arg10[%c0_13, %c0_14] : memref<8x8xf32, #tpu.memory_space<vmem>>, vector<8x8xf32>
    tpu.vector_store %arg10[%c0_13, %c0_14], %12 {strides = array<i32>} : memref<8x8xf32, #tpu.memory_space<vmem>>, vector<8x8xf32>,
    %c0_i32_15 = arith.constant 0 : i32
    %14 = arith.cmpi eq, %arg2, %c0_i32_15 : i32
    %15 = arith.extui %14 : i1 to i32
    %c0_i32_16 = arith.constant 0 : i32
    %16 = arith.cmpi ne, %15, %c0_i32_16 : i32
    scf.if %16 {
      %c0_17 = arith.constant 0 : index
      %c0_18 = arith.constant 0 : index
      %17 = vector.load %arg10[%c0_17, %c0_18] : memref<8x8xf32, #tpu.memory_space<vmem>>, vector<8x8xf32>
      %c0_19 = arith.constant 0 : index
      %c0_20 = arith.constant 0 : index
      %18 = vector.load %arg7[%c0_19, %c0_20] : memref<8x128xf32, #tpu.memory_space<vmem>>, vector<8x128xf32>
      %cst_21 = arith.constant dense<0.000000e+00> : vector<8x128xf32>
      %19 = tpu.matmul %17, %18, %cst_21 {dimension_numbers = #tpu.dot_dimension_numbers<[1], [0], [0], [1], [0, 0, 1, 1], [], []>} : vector<8x8xf32>, vector<8x128xf32>, vector<8x128xf32> -> vector<8x128xf32>
      %c0_22 = arith.constant 0 : index
      %c0_23 = arith.constant 0 : index
      %20 = vector.load %arg9[%c0_22, %c0_23] : memref<8x128xf32, #tpu.memory_space<vmem>>, vector<8x128xf32>
      %c0_24 = arith.constant 0 : index
      %c0_25 = arith.constant 0 : index
      %21 = vector.load %arg5[%c0_24, %c0_25] : memref<1x128xf32, #tpu.memory_space<vmem>>, vector<1x128xf32>
      %22 = vector.broadcast %21 : vector<1x128xf32> to vector<8x128xf32>
      %23 = arith.addf %20, %22 : vector<8x128xf32>
      %24 = arith.addf %23, %19 : vector<8x128xf32>
      %c0_26 = arith.constant 0 : index
      %c0_27 = arith.constant 0 : index
      %25 = vector.load %arg8[%c0_26, %c0_27] : memref<8x128xf32, #tpu.memory_space<vmem>>, vector<8x128xf32>
      tpu.vector_store %arg8[%c0_26, %c0_27], %24 {strides = array<i32>} : memref<8x128xf32, #tpu.memory_space<vmem>>, vector<8x128xf32>,
    } else {
    }
    return
  }
  func.func @transform_0(%arg0: i32, %arg1: i32, %arg2: i32) -> (i32, i32) {
    %c0_i32 = arith.constant 0 : i32
    return %arg0, %arg2 : i32, i32
  }
  func.func @transform_1(%arg0: i32, %arg1: i32, %arg2: i32) -> (i32, i32) {
    %c0_i32 = arith.constant 0 : i32
    return %arg2, %arg1 : i32, i32
  }
  func.func @transform_2(%arg0: i32, %arg1: i32, %arg2: i32) -> (i32, i32) {
    %c0_i32 = arith.constant 0 : i32
    %c0_i32_0 = arith.constant 0 : i32
    return %c0_i32, %arg1 : i32, i32
  }
  func.func @transform_3(%arg0: i32, %arg1: i32, %arg2: i32) -> (i32, i32) {
    %c0_i32 = arith.constant 0 : i32
    %c0_i32_0 = arith.constant 0 : i32
    return %arg2, %c0_i32 : i32, i32
  }
  func.func @transform_4(%arg0: i32, %arg1: i32, %arg2: i32) -> (i32, i32) {
    %c0_i32 = arith.constant 0 : i32
    %c0_i32_0 = arith.constant 0 : i32
    return %c0_i32, %arg1 : i32, i32
  }
  func.func @transform_5(%arg0: i32, %arg1: i32, %arg2: i32) -> (i32, i32) {
    %c0_i32 = arith.constant 0 : i32
    return %arg0, %arg1 : i32, i32
  }
}

</mosaic_0001>

<bundles_post_ra>
// kernel: tpu_custom_call.1
= control target key start
LH: loop header
LB: loop body
LE: loop exit
PB: predicated region body
PF: predicated region fallthrough
CT: control target
= control target key end

     0   :  { %10 = vsyncpa [#allocation5], 0  ;;  %s729_s0 = inlined_call_operand.vmem [shape: f32[8,128], index: 0, kind: input, shape index: {}]   ;;  %s730_s1 = inlined_call_operand.vmem [shape: f32[128,128], index: 1, kind: input, shape index: {}]   ;;  %s731_s2 = inlined_call_operand.vmem [shape: f32[1,128], index: 2, kind: input, shape index: {}]   ;;  %s732_s3 = inlined_call_operand.vmem [shape: f32[128,8], index: 3, kind: input, shape index: {}]   ;;  %s733_s4 = inlined_call_operand.hbm [shape: f32[8,128], index: 4, kind: input, shape index: {}]   ;;  %s734_s5 = inlined_call_operand.hbm [shape: f32[8,128], index: 5, kind: output, shape index: {}]  }
   0x1   :  { %11 = vsyncpa [#allocation6], 0  ;;  %s541_s18 = smov [#allocation4]   ;;  %s493_s22 = scalar_lea.hbm %s733_s4, 128 }
   0x2   :  { %s26_s19 = sshll.u32 %s541_s18, 4  ;;  %p494_p0 = scmp.ne.s32.totalorder %s733_s4, %s493_s22  ;;  %s27_s19 = int_to_ptr.vmem [resolvable:$true] %s26_s19 }
   0x3   :  { %p497_p1 = scmp.lt.u32.totalorder %s493_s22, %s733_s4 }
   0x5   :  { %p499_p2 = pnand %p497_p1, %p494_p0 }
   0x7   :  { %502 = shalt.err (!%p499_p2)
}
   0x8   :  { %s503_s27 = scalar_lea.vmem %s27_s19, 128  ;;  %p508_p4 = scmp.lt.s32.totalorder %s27_s19, %s27_s19 }
   0x9   :  { %p504_p3 = scmp.ne.s32.totalorder %s27_s19, %s503_s27  ;;  %p509_p5 = scmp.lt.s32.totalorder %s503_s27, %s503_s27 }
   0xb   :  { %p510_p6 = por %p509_p5, %p508_p4 }
   0xd   :  { %p511_p7 = pnand %p510_p6, %p504_p3 }
   0xf   :  { %514 = shalt.err (!%p511_p7)
}
  0x10   :  { %29 = dma.hbm_to_vmem [thread:$0]  %s733_s4, 128, %s27_s19, [#allocation5]  }
  0x11   :  { %537 = dma.done.wait [#allocation5], 128  }
  0x12   :  { %538 = vsyncadd [#allocation5], 4294967168  ;;  %vm38_vm0 = vcmask 64512   ;;  %v542_v0 = vmov 0.0|0.0   ;;  %vm543_vm1 = vmmov 0   ;;  %v544_v1 = vmov 0.0  }
  0x13   :  { %461 = vmatprep.subr.bf16.mxu1 %v542_v0  ;;  %429 = vmatprep.mubr.msk.f32.mxu1 %vm543_vm1, %v544_v1  ;;  %39 = vst.msk [vmem:[#allocation3] sm:$0xff] %vm38_vm0, %v544_v1  ;;  %v131_v2 = vld [vmem:[%s732_s3] sm:$0xff]  ;;  %v132_v3 = vld [vmem:[%s732_s3 + $0x8] sm:$0xff]  ;;  %v133_v4 = vld [vmem:[%s732_s3 + $0x10] sm:$0xff]  ;;  %s545_s17 = smov [#allocation7]  }
  0x14   :  { %437 = vmatprep.subr.bf16.mxu0 %v542_v0  ;;  %394 = vmatprep.mubr.msk.f32.mxu0 %vm543_vm1, %v544_v1  ;;  %v462_v5 = vpack.c.bf16 %v132_v3, %v131_v2  ;;  %v134_v6 = vld [vmem:[%s732_s3 + $0x18] sm:$0xff]  ;;  %v135_v8 = vld [vmem:[%s732_s3 + $0x20] sm:$0xff]  ;;  %v136_v9 = vld [vmem:[%s732_s3 + $0x28] sm:$0xff]  ;;  %s315_s18 = sshll.u32 %s545_s17, 4  ;;  %s316_s18 = int_to_ptr.vmem [resolvable:$true] %s315_s18 }
  0x15   :  { %v465_v7 = vpack.c.bf16 %v134_v6, %v133_v4  ;;  %v42_v10 = vld [vmem:[%s730_s1] sm:$0xff]  ;;  %v43_v11 = vld [vmem:[%s730_s1 + $0x8] sm:$0xff]  ;;  %v44_v12 = vld [vmem:[%s730_s1 + $0x10] sm:$0xff]  ;;  %v468_v14 = vpack.c.bf16 %v136_v9, %v135_v8  ;;  %s515_s19 = scalar_lea.vmem %s316_s18, 128  ;;  %p520_p9 = scmp.lt.s32.totalorder %s316_s18, %s316_s18 }
  0x16   :  { %463 = vmatpush3.bf16.msra.mxu1 %v462_v5  ;;  %v45_v13 = vld [vmem:[%s730_s1 + $0x18] sm:$0xff]  ;;  %v438_v15 = vpack.c.bf16 %v43_v11, %v42_v10  ;;  %v137_v16 = vld [vmem:[%s732_s3 + $0x30] sm:$0xff]  ;;  %v46_v19 = vld [vmem:[%s730_s1 + $0x20] sm:$0xff]  ;;  %p516_p8 = scmp.ne.s32.totalorder %s316_s18, %s515_s19  ;;  %p521_p10 = scmp.lt.s32.totalorder %s515_s19, %s515_s19 }
  0x17   :  { %464 = vmatprep.subr.bf16.mxu1 %v542_v0  ;;  %v138_v17 = vld [vmem:[%s732_s3 + $0x38] sm:$0xff]  ;;  %v441_v18 = vpack.c.bf16 %v45_v13, %v44_v12  ;;  %v47_v20 = vld [vmem:[%s730_s1 + $0x28] sm:$0xff]  ;;  %v139_v22 = vld [vmem:[%s732_s3 + $0x40] sm:$0xff] }
  0x18   :  { %439 = vmatpush3.bf16.msra.mxu0 %v438_v15  ;;  %v471_v21 = vpack.c.bf16 %v138_v17, %v137_v16  ;;  %v140_v23 = vld [vmem:[%s732_s3 + $0x48] sm:$0xff]  ;;  %v444_v24 = vpack.c.bf16 %v47_v20, %v46_v19  ;;  %v48_v25 = vld [vmem:[%s730_s1 + $0x30] sm:$0xff]  ;;  %v49_v26 = vld [vmem:[%s730_s1 + $0x38] sm:$0xff]  ;;  %p522_p11 = por %p521_p10, %p520_p9 }
  0x19   :  { %440 = vmatprep.subr.bf16.mxu0 %v542_v0  ;;  %v474_v27 = vpack.c.bf16 %v140_v23, %v139_v22  ;;  %v141_v28 = vld [vmem:[%s732_s3 + $0x50] sm:$0xff]  ;;  %v142_v29 = vld [vmem:[%s732_s3 + $0x58] sm:$0xff]  ;;  %v447_v30 = vpack.c.bf16 %v49_v26, %v48_v25  ;;  %v50_v31 = vld [vmem:[%s730_s1 + $0x40] sm:$0xff] }
  0x1a   :  { %466 = vmatpush3.bf16.msra.mxu1 %v465_v7  ;;  %v51_v32 = vld [vmem:[%s730_s1 + $0x48] sm:$0xff]  ;;  %v477_v33 = vpack.c.bf16 %v142_v29, %v141_v28  ;;  %v143_v34 = vld [vmem:[%s732_s3 + $0x60] sm:$0xff]  ;;  %v52_v37 = vld [vmem:[%s730_s1 + $0x50] sm:$0xff]  ;;  %p523_p12 = pnand %p522_p11, %p516_p8 }
  0x1b   :  { %467 = vmatprep.subr.bf16.mxu1 %v542_v0  ;;  %v144_v35 = vld [vmem:[%s732_s3 + $0x68] sm:$0xff]  ;;  %v450_v36 = vpack.c.bf16 %v51_v32, %v50_v31  ;;  %v53_v38 = vld [vmem:[%s730_s1 + $0x58] sm:$0xff]  ;;  %v145_v40 = vld [vmem:[%s732_s3 + $0x70] sm:$0xff] }
  0x1c   :  { %442 = vmatpush3.bf16.msra.mxu0 %v441_v18  ;;  %v480_v39 = vpack.c.bf16 %v144_v35, %v143_v34  ;;  %v146_v41 = vld [vmem:[%s732_s3 + $0x78] sm:$0xff]  ;;  %v453_v42 = vpack.c.bf16 %v53_v38, %v52_v37  ;;  %v54_v43 = vld [vmem:[%s730_s1 + $0x60] sm:$0xff]  ;;  %v55_v44 = vld [vmem:[%s730_s1 + $0x68] sm:$0xff] }
  0x1d   :  { %443 = vmatprep.subr.bf16.mxu0 %v542_v0  ;;  %v483_v45 = vpack.c.bf16 %v146_v41, %v145_v40  ;;  %v456_v46 = vpack.c.bf16 %v55_v44, %v54_v43  ;;  %v56_v47 = vld [vmem:[%s730_s1 + $0x70] sm:$0xff]  ;;  %v57_v48 = vld [vmem:[%s730_s1 + $0x78] sm:$0xff]  ;;  %v40_v49 = vld [vmem:[%s729_s0] sm:$0xff] }
  0x1e   :  { %469 = vmatpush3.bf16.msra.mxu1 %v468_v14  ;;  %v459_v50 = vpack.c.bf16 %v57_v48, %v56_v47  ;;  %v224_v51 = vld [vmem:[#allocation4] sm:$0xff]  ;;  %v130_v52 = vld [vmem:[#allocation3] sm:$0xff] }
  0x1f   :  { %470 = vmatprep.subr.bf16.mxu1 %v542_v0  ;;  %v325_v57 = vld [vmem:[%s731_s2] ss:$0 sm:$0xff] }
  0x20   :  { %445 = vmatpush3.bf16.msra.mxu0 %v444_v24 }
  0x21   :  { %446 = vmatprep.subr.bf16.mxu0 %v542_v0 }
  0x22   :  { %472 = vmatpush3.bf16.msra.mxu1 %v471_v21 }
  0x23   :  { %473 = vmatprep.subr.bf16.mxu1 %v542_v0 }
  0x24   :  { %448 = vmatpush3.bf16.msra.mxu0 %v447_v30 }
  0x25   :  { %449 = vmatprep.subr.bf16.mxu0 %v542_v0 }
  0x26   :  { %475 = vmatpush3.bf16.msra.mxu1 %v474_v27 }
  0x27   :  { %476 = vmatprep.subr.bf16.mxu1 %v542_v0 }
  0x28   :  { %451 = vmatpush3.bf16.msra.mxu0 %v450_v36 }
  0x29   :  { %452 = vmatprep.subr.bf16.mxu0 %v542_v0 }
  0x2a   :  { %478 = vmatpush3.bf16.msra.mxu1 %v477_v33 }
  0x2b   :  { %479 = vmatprep.subr.bf16.mxu1 %v542_v0 }
  0x2c   :  { %454 = vmatpush3.bf16.msra.mxu0 %v453_v42 }
  0x2d   :  { %455 = vmatprep.subr.bf16.mxu0 %v542_v0 }
  0x2e   :  { %481 = vmatpush3.bf16.msra.mxu1 %v480_v39 }
  0x2f   :  { %482 = vmatprep.subr.bf16.mxu1 %v542_v0 }
  0x30   :  { %457 = vmatpush3.bf16.msra.mxu0 %v456_v46 }
  0x31   :  { %458 = vmatprep.subr.bf16.mxu0 %v542_v0 }
  0x32   :  { %484 = vmatpush3.bf16.msra.mxu1 %v483_v45 }
  0x34   :  { %460 = vmatpush3.bf16.msra.mxu0 %v459_v50 }
  0x35   :  { %430 = vmatmul.mubr.f32.vlgmr.msra.gmra.mrb[0].mxu1 %v40_v49  ;;  %432 = vmatprep.subr.mxu0 %v544_v1 }
  0x37   :  { %395 = vmatmul.mubr.f32.vlgmr.msra.gmra.mrb[0].mxu0 %v40_v49 }
  0x38   :  { %434 = vmatprep.mubr.msk.f32.mxu0 %vm543_vm1, %v544_v1  ;;  %433 = vmatpush3.msra.mxu0 %v224_v51 }
 0x108   :  { %v213_v53 = vpop.f32.mrb[0].mxu1 }
 0x109   :  { %v217_v54 = vadd.f32 %v213_v53, %v130_v52  ;;  %v431_v55 = vpop.f32.mrb[1].mxu1 }
 0x10b   :  { %219 = vst.msk [vmem:[#allocation3] sm:$0xff] %vm38_vm0, %v217_v54 }
 0x112   :  { %v223_v56 = vld [vmem:[#allocation3] sm:$0xff] }
 0x113   :  { %435 = vmatmul.mubr.msk.f32.vlgmr.msra.gmra.mrb[0].mxu0 %vm38_vm0, %v223_v56 }
 0x1e6   :  { %v294_v58 = vpop.f32.mrb[0].mxu0 }
 0x1e7   :  { %v485_v59 = vadd.f32 %v325_v57, %v294_v58  ;;  %v436_v60 = vpop.f32.mrb[1].mxu0 }
 0x1e9   :  { %308 = vst [vmem:[#allocation7] sm:$0xff] %v485_v59 }
 0x1ea   :  { %526 = shalt.err (!%p523_p12)
}
 0x1eb   :  { %s527_s22 = scalar_lea.hbm %s734_s5, 128 }
 0x1ec   :  { %p528_p13 = scmp.ne.s32.totalorder %s734_s5, %s527_s22  ;;  %p531_p0 = scmp.lt.u32.totalorder %s527_s22, %s734_s5 }
 0x1ee   :  { %p533_p1 = pnand %p531_p0, %p528_p13 }
 0x1f0   :  { %536 = shalt.err (!%p533_p1)
}
 0x1f1   :  { %318 = dma.vmem_to_hbm [thread:$0]  %s316_s18, 128, %s734_s5, [#allocation6]  }
 0x1f2   :  { %539 = dma.done.wait [#allocation6], 128  }
 0x1f3   :  { %540 = vsyncadd [#allocation6], 4294967168 }
 0x1f4   :  { %322 = vsyncpa [#allocation5], 1 }
 0x1f5   :  { %323 = vsyncpa [#allocation6], 1 }

</bundles_post_ra>
